<compile_context>
chip_gen: v6e
topology: v6e:2x2x1
jax: 0.10.0
libtpu: 0.0.40
codegen_flags: <defaults>
</compile_context>

<pallas_src>
import functools

import jax
import jax.numpy as jnp
import numpy as np
from jax.experimental import pallas as pl
from jax.experimental.pallas import tpu as pltpu


# ----------------------- index target, (N, C, L) path -------------------------

def _bce_onehot_ncl_kernel(pred_ref, tgt_ref, sum_ref, cnt_ref,
                           acc_ref, cnt_acc_ref, *,
                           ignore_index, l_total, tiles_per_split,
                           bf16_softplus):
    p = pl.program_id(0)
    n = pl.program_id(1)
    l = pl.program_id(2)
    first = jnp.logical_and(n == 0, l == 0)
    last = jnp.logical_and(n == pl.num_programs(1) - 1,
                           l == pl.num_programs(2) - 1)

    @pl.when(first)
    def _():
        acc_ref[...] = jnp.zeros_like(acc_ref)
        cnt_acc_ref[...] = jnp.zeros_like(cnt_acc_ref)

    x = pred_ref[...].astype(jnp.float32)            # (1, C, TL)
    t = tgt_ref[...].astype(jnp.int32)               # (1, 1, TL), in-kernel cast
    _, c, tl = x.shape

    # Global lane-tile index (unclamped) -> mask off out-of-range/padded lanes.
    gb = p * tiles_per_split + l
    lane = jax.lax.broadcasted_iota(jnp.int32, (1, 1, tl), 2)
    inb = (gb * tl + lane) < l_total                 # (1, 1, TL)
    valid = jnp.logical_and(jnp.logical_and(t >= 0, t != ignore_index), inb)
    valid_row = valid[:, 0, :]                       # (1, TL)

    # Stable BCE-with-logits with the one-hot folded into a single select:
    #   max(x,0) - x*[t==c] + log1p(exp(-|x|))
    c_iota = jax.lax.broadcasted_iota(jnp.int32, (1, c, 1), 1)
    neg_abs = -jnp.abs(x)
    if bf16_softplus:
        sp = jnp.log1p(jnp.exp(neg_abs.astype(jnp.bfloat16))).astype(jnp.float32)
    else:
        sp = jnp.log1p(jnp.exp(neg_abs))
    elem = jnp.maximum(x, 0.0) - jnp.where(t == c_iota, x, 0.0) + sp

    # Sublane (C-axis) reduction on the XLU, then a small (1, TL) accumulate.
    row = jnp.sum(elem, axis=1)                      # (1, TL)
    acc_ref[...] += jnp.where(valid_row, row, 0.0)   # select also kills padded garbage
    cnt_acc_ref[...] += valid_row.astype(jnp.int32)  # exact int32 count

    @pl.when(last)
    def _():
        sum_ref[...] = jnp.full(sum_ref.shape, jnp.sum(acc_ref[...]),
                                dtype=jnp.float32)
        cnt_ref[...] = jnp.full(cnt_ref.shape, jnp.sum(cnt_acc_ref[...]),
                                dtype=jnp.int32)


def _run_onehot_ncl(pred_ncl, tgt_n1l, ignore_index, *,
                    max_tile_l=16384, num_splits=2,
                    block_budget_bytes=8 * 1024 * 1024,
                    bf16_softplus=False):
    n, c, l = pred_ncl.shape
    # Lane tile: as large as the double-buffered prediction blocks allow.
    by_budget = max(128, block_budget_bytes // (2 * c * pred_ncl.dtype.itemsize))
    tl_cap = max(128, min(max_tile_l, by_budget)) // 128 * 128
    tl = l if l <= tl_cap else tl_cap                # multiple of 128 or == L
    lt = pl.cdiv(l, tl)                              # total lane tiles
    tps = pl.cdiv(lt, num_splits)                    # tiles per parallel split

    def in_map(p, i, j):
        # clamp so padded splits / tail tiles read an in-bounds block
        return (i, 0, jnp.minimum(p * tps + j, lt - 1))

    def out_map(p, i, j):
        return (p, 0, 0)

    kern = functools.partial(_bce_onehot_ncl_kernel, ignore_index=ignore_index,
                             l_total=l, tiles_per_split=tps,
                             bf16_softplus=bf16_softplus)
    sums, cnts = pl.pallas_call(
        kern,
        out_shape=(jax.ShapeDtypeStruct((num_splits, 1, 128), jnp.float32),
                   jax.ShapeDtypeStruct((num_splits, 1, 128), jnp.int32)),
        grid=(num_splits, n, tps),
        in_specs=[pl.BlockSpec((1, c, tl), in_map),
                  pl.BlockSpec((1, 1, tl), in_map)],
        out_specs=(pl.BlockSpec((1, 1, 128), out_map),
                   pl.BlockSpec((1, 1, 128), out_map)),
        scratch_shapes=[pltpu.VMEM((1, tl), jnp.float32),
                        pltpu.VMEM((1, tl), jnp.int32)],
        compiler_params=pltpu.CompilerParams(
            dimension_semantics=("parallel", "arbitrary", "arbitrary")),
    )(pred_ncl, tgt_n1l)
    return jnp.sum(sums[:, 0, 0]), jnp.sum(cnts[:, 0, 0])


# ------------------------- index target, (N, C) path --------------------------

def _bce_onehot_nc_kernel(pred_ref, tgt_ref, sum_ref, cnt_ref,
                          acc_ref, cnt_acc_ref, *, ignore_index, n_rows):
    i = pl.program_id(0)

    @pl.when(i == 0)
    def _():
        acc_ref[...] = jnp.zeros_like(acc_ref)
        cnt_acc_ref[...] = jnp.zeros_like(cnt_acc_ref)

    x = pred_ref[...].astype(jnp.float32)            # (TR, C)
    t = tgt_ref[...].astype(jnp.int32)               # (TR, 1)
    tr, c = x.shape

    rvalid = (i * tr + jax.lax.broadcasted_iota(jnp.int32, (tr, 1), 0)) < n_rows
    valid = jnp.logical_and(jnp.logical_and(t >= 0, t != ignore_index), rvalid)

    lane = jax.lax.broadcasted_iota(jnp.int32, (1, c), 1)
    elem = (jnp.maximum(x, 0.0) - jnp.where(t == lane, x, 0.0)
            + jnp.log1p(jnp.exp(-jnp.abs(x))))

    # Sublane (row) reduction on the XLU; (1, C) accumulator.
    acc_ref[...] += jnp.sum(jnp.where(valid, elem, 0.0), axis=0, keepdims=True)
    cnt_acc_ref[...] += valid.astype(jnp.int32)

    @pl.when(i == pl.num_programs(0) - 1)
    def _():
        sum_ref[0, 0] = jnp.sum(acc_ref[...])
        cnt_ref[0, 0] = jnp.sum(cnt_acc_ref[...])


def _run_onehot_nc(pred_nc, tgt_n1, ignore_index, *, max_tile_r=4096,
                   block_budget_bytes=4 * 1024 * 1024):
    n, c = pred_nc.shape
    by_budget = max(8, block_budget_bytes // (2 * max(c, 1) * pred_nc.dtype.itemsize))
    row_cap = max(8, min(max_tile_r, by_budget)) // 8 * 8
    tr = n if n <= row_cap else row_cap              # multiple of 8 or == N
    kern = functools.partial(_bce_onehot_nc_kernel, ignore_index=ignore_index,
                             n_rows=n)
    s, cnt = pl.pallas_call(
        kern,
        out_shape=(jax.ShapeDtypeStruct((1, 1), jnp.float32),
                   jax.ShapeDtypeStruct((1, 1), jnp.int32)),
        grid=(pl.cdiv(n, tr),),
        in_specs=[pl.BlockSpec((tr, c), lambda i: (i, 0)),
                  pl.BlockSpec((tr, 1), lambda i: (i, 0))],
        out_specs=(pl.BlockSpec(memory_space=pltpu.SMEM),
                   pl.BlockSpec(memory_space=pltpu.SMEM)),
        scratch_shapes=[pltpu.VMEM((1, c), jnp.float32),
                        pltpu.VMEM((tr, 1), jnp.int32)],
        compiler_params=pltpu.CompilerParams(
            dimension_semantics=("arbitrary",)),
    )(pred_nc, tgt_n1)
    return s[0, 0], cnt[0, 0]


# --------------------- dense (same-shape binary target) path ------------------

def _bce_dense_kernel(pred_ref, tgt_ref, sum_ref, acc_ref, *,
                      n_rows, n_cols, tiles_per_split, bf16_softplus):
    p = pl.program_id(0)
    i = pl.program_id(1)
    j = pl.program_id(2)
    first = jnp.logical_and(i == 0, j == 0)
    last = jnp.logical_and(i == pl.num_programs(1) - 1,
                           j == pl.num_programs(2) - 1)

    @pl.when(first)
    def _():
        acc_ref[...] = jnp.zeros_like(acc_ref)

    x = pred_ref[...].astype(jnp.float32)            # (TR, TC)
    y = tgt_ref[...].astype(jnp.float32)
    tr, tc = x.shape

    gi = p * tiles_per_split + i                     # unclamped global row tile
    rmask = (gi * tr + jax.lax.broadcasted_iota(jnp.int32, (tr, 1), 0)) < n_rows
    cmask = (j * tc + jax.lax.broadcasted_iota(jnp.int32, (1, tc), 1)) < n_cols
    mask = jnp.logical_and(rmask, cmask)             # (TR, TC)

    neg_abs = -jnp.abs(x)
    if bf16_softplus:
        sp = jnp.log1p(jnp.exp(neg_abs.astype(jnp.bfloat16))).astype(jnp.float32)
    else:
        sp = jnp.log1p(jnp.exp(neg_abs))
    elem = jnp.where(mask, jnp.maximum(x, 0.0) - x * y + sp, 0.0)

    acc_ref[...] += jnp.sum(elem, axis=0, keepdims=True)   # sublane reduce -> (1, TC)

    @pl.when(last)
    def _():
        sum_ref[...] = jnp.full(sum_ref.shape, jnp.sum(acc_ref[...]),
                                dtype=jnp.float32)


def _run_dense(pred, tgt, *, max_tile_r=512, max_tile_c=2048, num_splits=2,
               block_budget_bytes=8 * 1024 * 1024, bf16_softplus=False):
    # Sublane/lane-dense 2-D view: collapse leading dims onto sublanes, keep the
    # contiguous trailing dim on lanes (pure reshape, no HBM rewrite).
    if pred.ndim >= 2:
        r = int(np.prod(pred.shape[:-1]))
        w = int(pred.shape[-1])
    elif pred.ndim == 1:
        r, w = 1, int(pred.shape[0])
    else:
        r, w = 1, 1
    pred2 = pred.reshape(r, w)
    tgt2 = tgt.reshape(r, w)

    bytes_per = pred2.dtype.itemsize + tgt2.dtype.itemsize
    # Lane tile: full width if small, otherwise a wide multiple-of-128 tile with
    # the ragged tail masked in-kernel (no divisibility requirement).
    tc = w if w <= max_tile_c else max_tile_c
    # Row tile bounded by the double-buffered input-block byte budget.
    by_budget = max(8, block_budget_bytes // (2 * max(tc, 1) * bytes_per))
    row_cap = max(8, min(max_tile_r, by_budget)) // 8 * 8
    tr = r if r <= row_cap else row_cap

    ct = pl.cdiv(w, tc)                              # lane tiles (last one masked)
    rt = pl.cdiv(r, tr)                              # row tiles
    rtps = pl.cdiv(rt, num_splits)                   # row tiles per parallel split

    def in_map(p, i, j):
        return (jnp.minimum(p * rtps + i, rt - 1), j)

    def out_map(p, i, j):
        return (p, 0, 0)

    kern = functools.partial(_bce_dense_kernel, n_rows=r, n_cols=w,
                             tiles_per_split=rtps, bf16_softplus=bf16_softplus)
    sums = pl.pallas_call(
        kern,
        out_shape=jax.ShapeDtypeStruct((num_splits, 1, 128), jnp.float32),
        grid=(num_splits, rtps, ct),
        in_specs=[pl.BlockSpec((tr, tc), in_map),
                  pl.BlockSpec((tr, tc), in_map)],
        out_specs=pl.BlockSpec((1, 1, 128), out_map),
        scratch_shapes=[pltpu.VMEM((1, tc), jnp.float32)],
        compiler_params=pltpu.CompilerParams(
            dimension_semantics=("parallel", "arbitrary", "arbitrary")),
    )(pred2, tgt2)
    return jnp.sum(sums[:, 0, 0]), jnp.float32(r * w)


# ------------------------------ module wrapper ---------------------------------

class BinaryCrossEntropyLoss:
    """JAX/Pallas re-implementation of ssseg BinaryCrossEntropyLoss.forward."""

    def __init__(self, scale_factor=1.0, weight=None, ignore_index=255,
                 reduction='mean', pos_weight=None, lowest_loss_value=None,
                 bf16_softplus=False):
        # TODO(synk): per-element `weight` and `pos_weight` (default None in the
        # module) are not implemented in the kernels.
        assert weight is None and pos_weight is None
        # TODO(synk): reduction='none' (per-element output) is not supported.
        assert reduction in ('mean', 'sum')
        self.scale_factor = scale_factor
        self.ignore_index = ignore_index
        self.reduction = reduction
        self.lowest_loss_value = lowest_loss_value
        # bf16 exp/log1p on the EUP (~2x softplus throughput on v6e/v7x).
        # Keep False on v5e (no bf16 EUP) or when tight f32 tolerance is needed.
        self.bf16_softplus = bf16_softplus

    def __call__(self, prediction, target):
        if prediction.ndim != target.ndim:
            assert (prediction.ndim == 2 and target.ndim == 1) or \
                   (prediction.ndim == 4 and target.ndim == 3)
            if prediction.ndim == 4:
                n, c, h, w = prediction.shape
                pred = prediction.reshape(n, c, h * w)       # native dtype, no copy
                tgt = target.reshape(n, 1, h * w)            # native dtype, no copy
                total, cnt = _run_onehot_ncl(pred, tgt, self.ignore_index,
                                             bf16_softplus=self.bf16_softplus)
            else:
                n, c = prediction.shape
                tgt = target.reshape(n, 1)
                total, cnt = _run_onehot_nc(prediction, tgt, self.ignore_index)
            denom = cnt.astype(jnp.float32) * jnp.float32(c)
        else:
            tgt = target
            if tgt.dtype == jnp.bool_:
                tgt = tgt.astype(prediction.dtype)
            total, denom = _run_dense(prediction, tgt,
                                      bf16_softplus=self.bf16_softplus)

        loss = total / denom if self.reduction == 'mean' else total
        loss = loss * self.scale_factor
        if self.lowest_loss_value is not None:
            loss = jnp.abs(loss - self.lowest_loss_value) + self.lowest_loss_value
        return loss


# ------------------------------ pure-JAX references ---------------------------

def _reference_onehot(prediction, target, ignore_index, reduction):
    c = prediction.shape[1]
    valid = (target >= 0) & (target != ignore_index)
    if prediction.ndim == 4:
        onehot = (target[:, None, :, :] == jnp.arange(c)[None, :, None, None])
        vmask = valid[:, None, :, :]
    else:
        onehot = (target[:, None] == jnp.arange(c)[None, :])
        vmask = valid[:, None]
    x = prediction.astype(jnp.float32)
    y = onehot.astype(jnp.float32)
    elem = jnp.maximum(x, 0.0) - x * y + jnp.log1p(jnp.exp(-jnp.abs(x)))
    elem = elem * vmask.astype(jnp.float32)
    total = jnp.sum(elem)
    count = jnp.sum(valid) * c
    return total / count if reduction == 'mean' else total


def _reference_dense(prediction, target, reduction):
    x = prediction.astype(jnp.float32)
    y = target.astype(jnp.float32)
    elem = jnp.maximum(x, 0.0) - x * y + jnp.log1p(jnp.exp(-jnp.abs(x)))
    return jnp.mean(elem) if reduction == 'mean' else jnp.sum(elem)


if __name__ == "__main__":
    key = jax.random.PRNGKey(0)
    keys = jax.random.split(key, 12)

    loss_fn = BinaryCrossEntropyLoss(scale_factor=1.0, ignore_index=255,
                                     reduction='mean')

    # 4-D segmentation case: prediction (N, C, H, W), integer target (N, H, W)
    N, C, H, W = 2, 4, 16, 16
    prediction = jax.random.normal(keys[0], (N, C, H, W), dtype=jnp.float32)
    target = jax.random.randint(keys[1], (N, H, W), 0, C, dtype=jnp.int32)
    ignore = jax.random.bernoulli(keys[2], 0.2, (N, H, W))
    target = jnp.where(ignore, 255, target)
    loss = jax.block_until_ready(loss_fn(prediction, target))
    ref = _reference_onehot(prediction, target, 255, 'mean')
    assert np.allclose(np.asarray(loss), np.asarray(ref), rtol=1e-5, atol=1e-6), (loss, ref)

    # Same 4-D path, but forcing multi-tile + 2-way split + ragged lane tail.
    N2_, C2_, H2_, W2_ = 2, 4, 16, 20                 # L = 320 -> 3 tiles of 128
    pred_m = jax.random.normal(keys[3], (N2_, C2_, H2_, W2_), dtype=jnp.float32)
    tgt_m = jax.random.randint(keys[4], (N2_, H2_, W2_), 0, C2_, dtype=jnp.int32)
    tgt_m = jnp.where(jax.random.bernoulli(keys[5], 0.3, (N2_, H2_, W2_)), 255, tgt_m)
    tot_m, cnt_m = _run_onehot_ncl(pred_m.reshape(N2_, C2_, H2_ * W2_),
                                   tgt_m.reshape(N2_, 1, H2_ * W2_),
                                   255, max_tile_l=128)
    loss_m = jax.block_until_ready(tot_m / (cnt_m.astype(jnp.float32) * C2_))
    ref_m = _reference_onehot(pred_m, tgt_m, 255, 'mean')
    assert np.allclose(np.asarray(loss_m), np.asarray(ref_m), rtol=1e-5, atol=1e-6), (loss_m, ref_m)

    # 2-D classification case: prediction (N, C), integer target (N,)
    N2, C2 = 8, 5
    pred2 = jax.random.normal(keys[6], (N2, C2), dtype=jnp.float32)
    tgt2 = jax.random.randint(keys[7], (N2,), 0, C2, dtype=jnp.int32)
    tgt2 = tgt2.at[0].set(255)  # one ignored sample
    loss2 = jax.block_until_ready(loss_fn(pred2, tgt2))
    ref2 = _reference_onehot(pred2, tgt2, 255, 'mean')
    assert np.allclose(np.asarray(loss2), np.asarray(ref2), rtol=1e-5, atol=1e-6), (loss2, ref2)

    # (N, C) path with forced row tiling + masked tail rows.
    N3, C3 = 20, 5
    pred3 = jax.random.normal(keys[8], (N3, C3), dtype=jnp.float32)
    tgt3 = jax.random.randint(keys[9], (N3,), 0, C3, dtype=jnp.int32)
    tgt3 = tgt3.at[3].set(255)
    tot3, cnt3 = _run_onehot_nc(pred3, tgt3.reshape(N3, 1), 255, max_tile_r=8)
    loss3 = jax.block_until_ready(tot3 / (cnt3.astype(jnp.float32) * C3))
    ref3 = _reference_onehot(pred3, tgt3, 255, 'mean')
    assert np.allclose(np.asarray(loss3), np.asarray(ref3), rtol=1e-5, atol=1e-6), (loss3, ref3)

    # dense case: prediction and binary float target of the same shape
    tgtd = jax.random.bernoulli(keys[10], 0.5, (N, C, H, W)).astype(jnp.float32)
    lossd = jax.block_until_ready(loss_fn(prediction, tgtd))
    refd = _reference_dense(prediction, tgtd, 'mean')
    assert np.allclose(np.asarray(lossd), np.asarray(refd), rtol=1e-5, atol=1e-6), (lossd, refd)

    # dense path with forced row/lane tiling + masked ragged lane tail (W=160)
    pde = jax.random.normal(keys[11], (2, 4, 8, 160), dtype=jnp.float32)
    tde = jax.random.bernoulli(jax.random.PRNGKey(1), 0.5,
                               (2, 4, 8, 160)).astype(jnp.float32)
    tot_e, den_e = _run_dense(pde, tde, max_tile_r=16, max_tile_c=128)
    loss_e = jax.block_until_ready(tot_e / den_e)
    ref_e = _reference_dense(pde, tde, 'mean')
    assert np.allclose(np.asarray(loss_e), np.asarray(ref_e), rtol=1e-5, atol=1e-6), (loss_e, ref_e)

    print("KERNEL_OK")
</pallas_src>

<mosaic_0001>
module attributes {stable_mosaic.version = 11 : i64} {
  func.func @_bce_onehot_ncl_kernel(%arg0: i32, %arg1: i32, %arg2: i32, %arg3: memref<1x4x256xf32, #tpu.memory_space<vmem>>, %arg4: memref<1x1x256xi32, #tpu.memory_space<vmem>>, %arg5: memref<1x1x128xf32, #tpu.memory_space<vmem>>, %arg6: memref<1x1x128xi32, #tpu.memory_space<vmem>>, %arg7: memref<1x256xf32, #tpu.memory_space<vmem>>, %arg8: memref<1x256xi32, #tpu.memory_space<vmem>>) attributes {dimension_semantics = [#tpu.dimension_semantics<parallel>, #tpu.dimension_semantics<arbitrary>, #tpu.dimension_semantics<arbitrary>], iteration_bounds = array<i64: 2, 2, 1>, scalar_prefetch = 0 : i64, scratch_operands = 2 : i64, tpu.core_type = #tpu.core_type<tc>, window_params = [{transform_indices = @transform_0, window_bounds = array<i64: 1, 4, 256>}, {transform_indices = @transform_1, window_bounds = array<i64: 1, 1, 256>}, {transform_indices = @transform_2, window_bounds = array<i64: 1, 1, 128>}, {transform_indices = @transform_3, window_bounds = array<i64: 1, 1, 128>}]} {
    %c0_i32 = arith.constant 0 : i32
    %0 = arith.cmpi eq, %arg1, %c0_i32 : i32
    %c0_i32_0 = arith.constant 0 : i32
    %1 = arith.cmpi eq, %arg2, %c0_i32_0 : i32
    %2 = arith.andi %0, %1 : i1
    %c1_i32 = arith.constant 1 : i32
    %3 = arith.cmpi eq, %arg1, %c1_i32 : i32
    %c0_i32_1 = arith.constant 0 : i32
    %4 = arith.cmpi eq, %arg2, %c0_i32_1 : i32
    %5 = arith.andi %3, %4 : i1
    %6 = arith.extui %2 : i1 to i32
    %c0_i32_2 = arith.constant 0 : i32
    %7 = arith.cmpi ne, %6, %c0_i32_2 : i32
    scf.if %7 {
      %cst_24 = arith.constant 0.000000e+00 : f32
      %52 = vector.broadcast %cst_24 : f32 to vector<1x256xf32>
      %c0_25 = arith.constant 0 : index
      %c0_26 = arith.constant 0 : index
      %53 = vector.load %arg7[%c0_25, %c0_26] : memref<1x256xf32, #tpu.memory_space<vmem>>, vector<1x256xf32>
      tpu.vector_store %arg7[%c0_25, %c0_26], %52 {strides = array<i32>} : memref<1x256xf32, #tpu.memory_space<vmem>>, vector<1x256xf32>,
      %c0_i32_27 = arith.constant 0 : i32
      %54 = vector.broadcast %c0_i32_27 : i32 to vector<1x256xi32>
      %c0_28 = arith.constant 0 : index
      %c0_29 = arith.constant 0 : index
      %55 = vector.load %arg8[%c0_28, %c0_29] : memref<1x256xi32, #tpu.memory_space<vmem>>, vector<1x256xi32>
      tpu.vector_store %arg8[%c0_28, %c0_29], %54 {strides = array<i32>} : memref<1x256xi32, #tpu.memory_space<vmem>>, vector<1x256xi32>,
    } else {
    }
    %c0 = arith.constant 0 : index
    %c0_3 = arith.constant 0 : index
    %c0_4 = arith.constant 0 : index
    %8 = vector.load %arg3[%c0, %c0_3, %c0_4] : memref<1x4x256xf32, #tpu.memory_space<vmem>>, vector<1x4x256xf32>
    %c0_5 = arith.constant 0 : index
    %c0_6 = arith.constant 0 : index
    %c0_7 = arith.constant 0 : index
    %9 = vector.load %arg4[%c0_5, %c0_6, %c0_7] : memref<1x1x256xi32, #tpu.memory_space<vmem>>, vector<1x1x256xi32>
    %c1_i32_8 = arith.constant 1 : i32
    %10 = arith.muli %arg0, %c1_i32_8 : i32
    %11 = arith.addi %10, %arg2 : i32
    %12 = tpu.iota {dimensions = array<i32: 2>} : vector<1x1x256xi32>
    %c256_i32 = arith.constant 256 : i32
    %13 = arith.muli %11, %c256_i32 : i32
    %14 = vector.broadcast %13 : i32 to vector<1x1x256xi32>
    %15 = arith.addi %14, %12 : vector<1x1x256xi32>
    %c256_i32_9 = arith.constant 256 : i32
    %16 = vector.broadcast %c256_i32_9 : i32 to vector<1x1x256xi32>
    %17 = arith.cmpi slt, %15, %16 : vector<1x1x256xi32>
    %c0_i32_10 = arith.constant 0 : i32
    %18 = vector.broadcast %c0_i32_10 : i32 to vector<1x1x256xi32>
    %19 = arith.cmpi sge, %9, %18 : vector<1x1x256xi32>
    %c255_i32 = arith.constant 255 : i32
    %20 = vector.broadcast %c255_i32 : i32 to vector<1x1x256xi32>
    %21 = arith.cmpi ne, %9, %20 : vector<1x1x256xi32>
    %22 = arith.andi %19, %21 : vector<1x1x256xi1>
    %23 = arith.andi %22, %17 : vector<1x1x256xi1>
    %24 = vector.shape_cast %23 : vector<1x1x256xi1> to vector<1x256xi1>
    %25 = tpu.iota {dimensions = array<i32: 1>} : vector<1x4x1xi32>
    %26 = math.absf %8 : vector<1x4x256xf32>
    %cst = arith.constant 0.000000e+00 : f32
    %27 = vector.broadcast %cst : f32 to vector<1x4x256xf32>
    %28 = arith.subf %27, %26 : vector<1x4x256xf32>
    %29 = math.exp %28 : vector<1x4x256xf32>
    %30 = math.log1p %29 : vector<1x4x256xf32>
    %cst_11 = arith.constant 0.000000e+00 : f32
    %31 = vector.broadcast %cst_11 : f32 to vector<1x4x256xf32>
    %32 = arith.maximumf %8, %31 : vector<1x4x256xf32>
    %33 = vector.broadcast %9 : vector<1x1x256xi32> to vector<1x4x256xi32>
    %34 = vector.broadcast %25 : vector<1x4x1xi32> to vector<1x4x256xi32>
    %35 = arith.cmpi eq, %33, %34 : vector<1x4x256xi32>
    %cst_12 = arith.constant 0.000000e+00 : f32
    %36 = vector.broadcast %cst_12 : f32 to vector<1x4x256xf32>
    %37 = arith.select %35, %8, %36 : vector<1x4x256xi1>, vector<1x4x256xf32>
    %38 = arith.subf %32, %37 : vector<1x4x256xf32>
    %39 = arith.addf %38, %30 : vector<1x4x256xf32>
    %cst_13 = arith.constant dense<0.000000e+00> : vector<1x256xf32>
    %40 = vector.multi_reduction <add>, %39, %cst_13 [1] : vector<1x4x256xf32> to vector<1x256xf32>
    %c0_14 = arith.constant 0 : index
    %c0_15 = arith.constant 0 : index
    %41 = vector.load %arg7[%c0_14, %c0_15] : memref<1x256xf32, #tpu.memory_space<vmem>>, vector<1x256xf32>
    %cst_16 = arith.constant 0.000000e+00 : f32
    %42 = vector.broadcast %cst_16 : f32 to vector<1x256xf32>
    %43 = arith.select %24, %40, %42 : vector<1x256xi1>, vector<1x256xf32>
    %44 = arith.addf %41, %43 : vector<1x256xf32>
    %c0_17 = arith.constant 0 : index
    %c0_18 = arith.constant 0 : index
    %45 = vector.load %arg7[%c0_17, %c0_18] : memref<1x256xf32, #tpu.memory_space<vmem>>, vector<1x256xf32>
    tpu.vector_store %arg7[%c0_17, %c0_18], %44 {strides = array<i32>} : memref<1x256xf32, #tpu.memory_space<vmem>>, vector<1x256xf32>,
    %c0_19 = arith.constant 0 : index
    %c0_20 = arith.constant 0 : index
    %46 = vector.load %arg8[%c0_19, %c0_20] : memref<1x256xi32, #tpu.memory_space<vmem>>, vector<1x256xi32>
    %47 = arith.extui %24 : vector<1x256xi1> to vector<1x256xi32>
    %48 = arith.addi %46, %47 : vector<1x256xi32>
    %c0_21 = arith.constant 0 : index
    %c0_22 = arith.constant 0 : index
    %49 = vector.load %arg8[%c0_21, %c0_22] : memref<1x256xi32, #tpu.memory_space<vmem>>, vector<1x256xi32>
    tpu.vector_store %arg8[%c0_21, %c0_22], %48 {strides = array<i32>} : memref<1x256xi32, #tpu.memory_space<vmem>>, vector<1x256xi32>,
    %50 = arith.extui %5 : i1 to i32
    %c0_i32_23 = arith.constant 0 : i32
    %51 = arith.cmpi ne, %50, %c0_i32_23 : i32
    scf.if %51 {
      %c0_24 = arith.constant 0 : index
      %c0_25 = arith.constant 0 : index
      %52 = vector.load %arg7[%c0_24, %c0_25] : memref<1x256xf32, #tpu.memory_space<vmem>>, vector<1x256xf32>
      %53 = vector.shape_cast %52 : vector<1x256xf32> to vector<1x1x256xf32>
      %cst_26 = arith.constant dense<0.000000e+00> : vector<1xf32>
      %54 = vector.multi_reduction <add>, %53, %cst_26 [1, 2] : vector<1x1x256xf32> to vector<1xf32>
      %55 = vector.shape_cast %54 : vector<1xf32> to vector<1x1x1xf32>
      %56 = vector.extract %55[0, 0, 0] : f32 from vector<1x1x1xf32>
      %57 = vector.broadcast %56 : f32 to vector<1x1x128xf32>
      %c0_27 = arith.constant 0 : index
      %c0_28 = arith.constant 0 : index
      %c0_29 = arith.constant 0 : index
      %58 = vector.load %arg5[%c0_27, %c0_28, %c0_29] : memref<1x1x128xf32, #tpu.memory_space<vmem>>, vector<1x1x128xf32>
      tpu.vector_store %arg5[%c0_27, %c0_28, %c0_29], %57 {strides = array<i32>} : memref<1x1x128xf32, #tpu.memory_space<vmem>>, vector<1x1x128xf32>,
      %c0_30 = arith.constant 0 : index
      %c0_31 = arith.constant 0 : index
      %59 = vector.load %arg8[%c0_30, %c0_31] : memref<1x256xi32, #tpu.memory_space<vmem>>, vector<1x256xi32>
      %60 = vector.shape_cast %59 : vector<1x256xi32> to vector<1x1x256xi32>
      %cst_32 = arith.constant dense<0> : vector<1xi32>
      %61 = vector.multi_reduction <add>, %60, %cst_32 [1, 2] : vector<1x1x256xi32> to vector<1xi32>
      %62 = vector.shape_cast %61 : vector<1xi32> to vector<1x1x1xi32>
      %63 = vector.extract %62[0, 0, 0] : i32 from vector<1x1x1xi32>
      %64 = vector.broadcast %63 : i32 to vector<1x1x128xi32>
      %c0_33 = arith.constant 0 : index
      %c0_34 = arith.constant 0 : index
      %c0_35 = arith.constant 0 : index
      %65 = vector.load %arg6[%c0_33, %c0_34, %c0_35] : memref<1x1x128xi32, #tpu.memory_space<vmem>>, vector<1x1x128xi32>
      tpu.vector_store %arg6[%c0_33, %c0_34, %c0_35], %64 {strides = array<i32>} : memref<1x1x128xi32, #tpu.memory_space<vmem>>, vector<1x1x128xi32>,
    } else {
    }
    return
  }
  func.func @transform_0(%arg0: i32, %arg1: i32, %arg2: i32) -> (i32, i32, i32) {
    %c1_i32 = arith.constant 1 : i32
    %0 = arith.muli %arg0, %c1_i32 : i32
    %1 = arith.addi %0, %arg2 : i32
    %c0_i32 = arith.constant 0 : i32
    %2 = arith.minsi %1, %c0_i32 : i32
    %c0_i32_0 = arith.constant 0 : i32
    %c0_i32_1 = arith.constant 0 : i32
    return %arg1, %c0_i32_0, %2 : i32, i32, i32
  }
  func.func @transform_1(%arg0: i32, %arg1: i32, %arg2: i32) -> (i32, i32, i32) {
    %c1_i32 = arith.constant 1 : i32
    %0 = arith.muli %arg0, %c1_i32 : i32
    %1 = arith.addi %0, %arg2 : i32
    %c0_i32 = arith.constant 0 : i32
    %2 = arith.minsi %1, %c0_i32 : i32
    %c0_i32_0 = arith.constant 0 : i32
    %c0_i32_1 = arith.constant 0 : i32
    return %arg1, %c0_i32_0, %2 : i32, i32, i32
  }
  func.func @transform_2(%arg0: i32, %arg1: i32, %arg2: i32) -> (i32, i32, i32) {
    %c0_i32 = arith.constant 0 : i32
    %c0_i32_0 = arith.constant 0 : i32
    %c0_i32_1 = arith.constant 0 : i32
    return %arg0, %c0_i32, %c0_i32_0 : i32, i32, i32
  }
  func.func @transform_3(%arg0: i32, %arg1: i32, %arg2: i32) -> (i32, i32, i32) {
    %c0_i32 = arith.constant 0 : i32
    %c0_i32_0 = arith.constant 0 : i32
    %c0_i32_1 = arith.constant 0 : i32
    return %arg0, %c0_i32, %c0_i32_0 : i32, i32, i32
  }
}

</mosaic_0001>

<bundles_post_ra>
// kernel: tpu_custom_call.1
= control target key start
LH: loop header
LB: loop body
LE: loop exit
PB: predicated region body
PF: predicated region fallthrough
CT: control target
= control target key end

     0   :  { %s1337_s0 = inlined_call_operand.hbm [shape: f32[2,4,256], index: 0, kind: input, shape index: {}]   ;;  %s1338_s1 = inlined_call_operand.hbm [shape: s32[2,1,256], index: 1, kind: input, shape index: {}]   ;;  %s1339_s2 = inlined_call_operand.hbm [shape: f32[2,1,128], index: 2, kind: output, shape index: {0}]   ;;  %s1340_s3 = inlined_call_operand.hbm [shape: s32[2,1,128], index: 3, kind: output, shape index: {1}]  }
   0x1   :  { %1346 = sst [smem:[#allocation21_spill]] %s1337_s0 }
   0x2   :  { %9 = vsyncpa [#allocation5], 0 }
   0x3   :  { %11 = vsyncpa [#allocation5 + $0x1], 0 }
   0x4   :  { %12 = vsyncpa [#allocation8], 0 }
   0x5   :  { %14 = vsyncpa [#allocation8 + $0x1], 0 }
   0x6   :  { %15 = vsyncpa [#allocation6], 0 }
   0x7   :  { %17 = vsyncpa [#allocation6 + $0x1], 0 }
   0x8   :  { %18 = vsyncpa [#allocation11], 0 }
   0x9   :  { %20 = vsyncpa [#allocation11 + $0x1], 0  ;;  %s1041_s12 = smov 0   ;;  %s1043_s13 = smov 0  }
   0xa   :  { %s1045_s14 = smov 0   ;;  %s1047_s15 = smov 0  }
   0xb   :  { %s1049_s16 = smov 0   ;;  %s1051_s17 = smov 0  }
   0xc   :  { %s1053_s18 = smov 0   ;;  %s1055_s19 = smov 0  }
   0xd   :  { %s1057_s20 = smov 0   ;;  %s1059_s21 = smov 0  }
   0xe   :  { %s1061_s22 = smov 0  }
   0xf LB: > { %1347 = sst [smem:[#allocation16_spill]] %s1003_s20  ;;  %s650_s23 = sadd.s32 4294967295, %s1011_s22   ;;  %s1011_s22 = sphi %s1061_s22, %s26_s22   ;;  %s1007_s21 = sphi %s1059_s21, %s1373_s21   ;;  %s1003_s20 = sphi %s1057_s20, %s1372_s20   ;;  %s999_s19 = sphi %s1055_s19, %s1371_s19   ;;  %s995_s18 = sphi %s1053_s18, %s1370_s18   ;;  %s991_s17 = sphi %s1051_s17, %s1379_s17   ;;  %s987_s16 = sphi %s1049_s16, %s1378_s16   ;;  %s983_s15 = sphi %s1047_s15, %s1377_s15   ;;  %s979_s14 = sphi %s1045_s14, %s1376_s14   ;;  %s975_s13 = sphi %s1043_s13, %s1375_s13   ;;  %s971_s12 = sphi %s1041_s12, %s1374_s12  }
  0x10   : > { %1348 = sst [smem:[#allocation17_spill]] %s1007_s21  ;;  %s651_s24 = sadd.s32 4294967294, %s1011_s22  }
  0x11   : > { %s41_s25 = sadd.s32 1, %s1003_s20  ;;  %s45_s26 = sadd.s32 1, %s1007_s21 }
  0x12   : > { %p43_p0 = scmp.ge.s32.totalorder %s41_s25, 2  ;;  %s60_s27 = sadd.s32 1, %s991_s17 }
  0x13   : > { %p67_p1 = scmp.ne.s32.totalorder %s991_s17, %s987_s16  ;;  %p68_p3 = scmp.eq.s32.totalorder %s1011_s22, 0 }
  0x14   : > { %s1381_s25 = smov (%p43_p0, %s41_s25), 0  ;;  %s1383_s26 = smov (!%p43_p0, %s45_s26), %s1007_s21 }
  0x15   : > { %1349 = sst [smem:[#allocation18_spill]] %s1381_s25  ;;  %p47_p2 = scmp.ge.s32.totalorder %s1383_s26, 2 }
  0x16   : > { %s55_s28 = ssub.s32 %s1003_s20, %s1381_s25  ;;  %p73_p4 = scmp.ne.s32.totalorder %s987_s16, %s983_s15 }
  0x17   : > { %s1385_s26 = smov (%p47_p2, %s1383_s26), 0  ;;  %p1110_p5 = por %p68_p3, %p67_p1 }
  0x18   : > { %1350 = sst [smem:[#allocation19_spill]] %s1385_s26  ;;  %p74_p6 = scmp.eq.s32.totalorder %s650_s23, 0 }
  0x19   : > { %s117_s30 = ssub.s32 %s1007_s21, %s1385_s26  ;;  %s120_s5 = sadd.s32 1, %s979_s14 }
  0x1a   : > { %p1116_p7 = por %p74_p6, %p73_p4  ;;  %p118_p8 = scmp.eq.s32.totalorder %s117_s30, 0 }
  0x1b   : > { %p130_p9 = scmp.ne.s32.totalorder %s979_s14, %s975_s13  ;;  %p131_p10 = scmp.eq.s32.totalorder %s650_s23, 3 }
  0x1c   : > { %p136_p11 = scmp.ne.s32.totalorder %s975_s13, %s971_s12  ;;  %p58_p12 = scmp.eq.s32.totalorder %s55_s28, 0 }
  0x1d   : > { %p1125_p13 = por %p131_p10, %p130_p9  ;;  %p137_p0 = scmp.eq.s32.totalorder %s651_s24, 3 }
  0x1e   : > { %s1130_s7 = scalar_select %p118_p8, %s979_s14, %s120_s5  }
  0x1f   : > { %s1353_s6 = scalar_select %p1125_p13, 1, 0 }
  0x20   : > { %s1133_s8 = scalar_select %p58_p12, %s991_s17, %s60_s27  }
  0x21   : > { %p700_p1 = scmp.lt.s32.totalorder %s1011_s22, 4  ;;  %s1137_s9 = sand.u32 1, %s991_s17  }
  0x22   : > { %1354 = sst [smem:[#allocation20_spill]] %s1133_s8  ;;  %p1139_p2 = por %p137_p0, %p136_p11 }
  0x23   : > { %s654_s11 = sshll.u32 %s1137_s9, 3  ;;  %s967_s28 = sshll.u32 %s1003_s20, 7 }
  0x24   : > { %s1355_s10 = scalar_select %p1139_p2, 1, 0 }
  0x25   : > { %s187_s15 = scalar_lea.vmem [#allocation4], %s654_s11  ;;  %s1356_s0 = sld [smem:[#allocation21_spill]] }
  0x26   : > { %s200_s23 = sshll.u32 %s187_s15, 4  ;;  %p1152_p3 = pnand %p700_p1, %p1110_p5  ;;  %s1145_s23 = int_to_ptr.vmem [resolvable:$true] %s200_s23 }
  0x27   : > { %s184_s26 = scalar_lea.sflag [#allocation5], %s1137_s9 }
  0x28   : > { %p801_p9 = pneg %p1152_p3 }
  0x2b   : > { %s198_s27 = scalar_lea.hbm %s1356_s0, %s967_s28  ;;  %s804_s29 = scalar_lea.hbm %s1356_s0, 256 }
  0x2c   : > { %s799_s25 = scalar_lea.hbm %s198_s27, 128 }
  0x2d   : > { %p800_p8 = scmp.ne.s32.totalorder %s198_s27, %s799_s25  ;;  %p806_p5 = scmp.lt.s32.totalorder %s804_s29, %s799_s25 }
  0x2f   : > { %p802_p10 = pnand %p801_p9, %p800_p8 }
  0x31   : > { %p803_p11 = pneg %p802_p10 }
  0x33   : > { %p808_p12 = pnand %p806_p5, %p803_p11 }
  0x35   : > { %811 = shalt.err (!%p808_p12)
}
  0x36   : > { %s812_s28 = scalar_lea.vmem %s1145_s23, 128  ;;  %s1013_s30 = smov [#allocation4]  }
  0x37   : > { %p813_p0 = scmp.ne.s32.totalorder %s1145_s23, %s812_s28  ;;  %s817_s5 = sshll.u32 %s1013_s30, 4  ;;  %s818_s5 = int_to_ptr.vmem [resolvable:$false] %s817_s5 }
  0x38   : > { %s819_s21 = scalar_lea.vmem %s818_s5, 256  ;;  %p820_p8 = scmp.lt.s32.totalorder %s1145_s23, %s818_s5 }
  0x39   : > { %p815_p1 = pnand %p813_p0, %p801_p9  ;;  %p821_p10 = scmp.lt.s32.totalorder %s819_s21, %s812_s28 }
  0x3b   : > { %p816_p4 = pneg %p815_p1  ;;  %p822_p6 = por %p821_p10, %p820_p8 }
  0x3d   : > { %p823_p2 = pnand %p822_p6, %p816_p4 }
  0x3f   : > { %826 = shalt.err (!%p823_p2)
}
  0x40   : > { %689 = dma.hbm_to_vmem [thread:$0]  (!%p1152_p3), %s198_s27, 128, %s1145_s23, %s184_s26  }
  0x41   : > { %p1358_p11 = scmp.lt.s32.totalorder %s1011_s22, 5  ;;  %p1359_p5 = scmp.ge.s32.totalorder %s1011_s22, 1 }
  0x42   : > { %s658_s21 = sshll.u32 %s1137_s9, 1  ;;  %s968_s11 = sshll.u32 %s1003_s20, 5 }
  0x43   : > { %p1180_p12 = pnand %p1359_p5, %p1358_p11  ;;  %s222_s28 = scalar_lea.hbm %s1338_s1, %s968_s11 }
  0x44   : > { %s211_s30 = scalar_lea.vmem [#allocation7], %s658_s21  ;;  %s208_s0 = scalar_lea.sflag [#allocation8], %s1137_s9 }
  0x45   : > { %s224_s5 = sshll.u32 %s211_s30, 4  ;;  %s827_s8 = scalar_lea.hbm %s222_s28, 32  ;;  %s225_s5 = int_to_ptr.vmem [resolvable:$true] %s224_s5 }
  0x46   : > { %p828_p2 = scmp.ne.s32.totalorder %s222_s28, %s827_s8  ;;  %s832_s27 = scalar_lea.hbm %s1338_s1, 64 }
  0x47   : > { %p834_p0 = scmp.lt.s32.totalorder %s832_s27, %s827_s8 }
  0x48   : > { %p830_p4 = pnand %p828_p2, %p801_p9 }
  0x4a   : > { %p831_p6 = pneg %p830_p4 }
  0x4c   : > { %p836_p1 = pnand %p834_p0, %p831_p6 }
  0x4e   : > { %839 = shalt.err (!%p836_p1)
}
  0x4f   : > { %s840_s20 = scalar_lea.vmem %s225_s5, 32  ;;  %s1014_s9 = smov [#allocation7]  }
  0x50   : > { %p841_p8 = scmp.ne.s32.totalorder %s225_s5, %s840_s20  ;;  %s845_s21 = sshll.u32 %s1014_s9, 4  ;;  %s846_s21 = int_to_ptr.vmem [resolvable:$false] %s845_s21 }
  0x51   : > { %s847_s11 = scalar_lea.vmem %s846_s21, 64  ;;  %p848_p5 = scmp.lt.s32.totalorder %s225_s5, %s846_s21 }
  0x52   : > { %p843_p10 = pnand %p841_p8, %p801_p9  ;;  %p849_p2 = scmp.lt.s32.totalorder %s847_s11, %s840_s20 }
  0x54   : > { %p844_p11 = pneg %p843_p10  ;;  %p850_p4 = por %p849_p2, %p848_p5 }
  0x56   : > { %p851_p13 = pnand %p850_p4, %p844_p11 }
  0x58   : > { %854 = shalt.err (!%p851_p13)
}
  0x59   : > { %692 = dma.hbm_to_vmem [thread:$0]  (!%p1152_p3), %s222_s28, 32, %s225_s5, %s208_s0  }
  0x5a   : > { %233 = sbr.rel (%p1180_p12) target bundleno = 435 (0x1b3), region = 28  ;;  %s235_s8 = sand.u32 (!%p1180_p12), 1, %s987_s16  }
  0x5b   : > { %s663_s15 = sshll.u32 (!%p1180_p12), %s235_s8, 3  ;;  %s236_s29 = scalar_lea.sflag (!%p1180_p12), [#allocation5], %s235_s8 }
  0x5c   : > { %s239_s30 = scalar_lea.vmem (!%p1180_p12), [#allocation4], %s663_s15 }
  0x5f   : > { %952 = dma.done.wait (%p1116_p7), %s236_s29, 128  }
  0x60   : > { %954 = vsyncadd (%p1116_p7), %s236_s29, 4294967168  ;;  %s664_s20 = sshll.u32 %s235_s8, 1  ;;  %s245_s26 = scalar_lea.sflag [#allocation8], %s235_s8 }
  0x61   : > { %s1208_s23 = scalar_lea.vmem [#allocation7], %s664_s20 }
  0x62   : > { %956 = dma.done.wait (%p1116_p7), %s245_s26, 32  }
  0x63   : > { %958 = vsyncadd (%p1116_p7), %s245_s26, 4294967264  ;;  %s1215_s0 = sand.u32 1, %s975_s13   ;;  %p287_p13 = scmp.eq.s32.totalorder %s995_s18, 0 }
  0x64   : > { %p291_p3 = scmp.eq.s32.totalorder %s995_s18, 1  ;;  %s272_s24 = scalar_lea.vmem [#allocation9], %s1215_s0  ;;  %v296_v0 = vlaneseq (%p287_p13)  ;;  %v1015_v1 = vmov (%p287_p13), 0.0   ;;  %v1016_v2 = vmov (%p287_p13), 0  }
  0x65   : > { %s278_s25 = scalar_lea.vmem [#allocation10], %s1215_s0  ;;  %295 = sbr.rel (!%p287_p13) target bundleno = 106 (0x6a), region = 40 }
  0x66   : > { %vm298_vm0 = vcmp.lt.s32.totalorder (%p287_p13), %v296_v0, 256 }
  0x67   : > { %300 = vst.msk [vmem:[#allocation2] sm:$0x3] (%p287_p13), %vm298_vm0, %v1015_v1  ;;  %301 = vst.msk [vmem:[#allocation3] sm:$0x3] (%p287_p13), %vm298_vm0, %v1016_v2 }
  0x6a PF: > { %v302_v3 = vld [vmem:[%s239_s30] sm:$0xff]  ;;  %v305_v4 = vlaneseq  ;;  %s667_s4 = sshll.u32 %s999_s19, 8  ;;  %v1017_v7 = vmov 1966171168   ;;  %v1018_v17 = vmov 0   ;;  %vm376_vm12 = vcmask 1043456  }
  0x6b   : > { %v309_v5 = vstv %s667_s4  ;;  %v321_v8 = vunpack.c.l.s4 %v1017_v7  ;;  %v338_v9 = vand.u32 2147483647, %v302_v3  ;;  %v303_v21 = vld [vmem:[%s1208_s23] sm:$0x3]  ;;  %v363_v37 = vcombine.high %v302_v3, %v302_v3 }
  0x6c   : > { %v306_v6 = vand.u32 127, %v305_v4  ;;  %v324_v15 = vshrl.u32 %v305_v4, 7  ;;  %vm314_vm3 = vcmp.ge.s32.totalorder %v303_v21, 0  ;;  %vm315_vm4 = vcmp.ne.s32.totalorder %v303_v21, 255 }
  0x6d   : > { %v322_v12 = vunpack.c.0.s8 %v321_v8  ;;  %v339_v13 = vsub.f32 0.0, %v338_v9  ;;  %vm1223_vm5 = vmand %vm314_vm3, %vm315_vm4  ;;  %vm1235_vm8 = vcmp.lt.s32.totalorder %v305_v4, 256  ;;  %v351_v43 = vmax.f32 %v302_v3, 0.0 }
  0x6e   : > { %v307_v10 = vadd.s32 128, %v306_v6  ;;  %v310_v11 = vadd.s32 %v309_v5, %v306_v6  ;;  %v417_v27 = vld [vmem:[#allocation3] sm:$0x3]  ;;  %v354_v30 = vsub.s32 0, %v324_v15  ;;  %v358_v31 = vsub.s32 1, %v324_v15 }
  0x6f   : > { %v340_v16 = vmul.f32 1.442695, %v339_v13  ;;  %v325_v19 = vsub.s32 %v322_v12, %v324_v15  ;;  %v391_v4 = vld [vmem:[#allocation2] sm:$0x3]  ;;  %vm435_vm13 = vcmask (%p291_p3), 1040384  }
  0x70   : > { %v311_v14 = vadd.s32 %v309_v5, %v307_v10  ;;  %vm312_vm1 = vcmp.lt.s32.totalorder %v310_v11, 256  ;;  %v355_v35 = vrot.slane %v303_v21, %v354_v30  ;;  %v359_v36 = vrot.slane %v303_v21, %v358_v31 }
  0x71   : > { %v317_v18 = vsel %vm312_vm1, 1, %v1018_v17  ;;  %795 = vpow2.f32 %v340_v16 }
  0x72   : > { %vm313_vm2 = vcmp.lt.s32.totalorder %v311_v14, 256  ;;  %vm360_vm9 = vcmp.eq.s32.totalorder %v355_v35, %v324_v15  ;;  %vm361_vm10 = vcmp.eq.s32.totalorder %v359_v36, %v324_v15 }
  0x73   : > { %v318_v20 = vsel %vm313_vm2, 1, %v1018_v17  ;;  %v365_v39 = vsel %vm360_vm9, %v302_v3, 0.0  ;;  %v366_v40 = vsel %vm361_vm10, %v363_v37, 0.0 }
  0x74   : > { %v319_v22 = vcombine.low %v317_v18, %v318_v20  ;;  %v369_v44 = vcombine.low %v365_v39, %v366_v40 }
  0x76   : > { %v326_v23 = vrot.slane %v319_v22, %v325_v19  ;;  %v371_v47 = vsub.f32 %v351_v43, %v369_v44 }
  0x78   : > { %v333_v25 = vrot.slane %v326_v23, %v325_v19 }
  0x7a   : > { %vm1227_vm6 = vcmp.ne.s32.totalorder %v333_v25, 0 }
  0x7b   : > { %vm335_vm7 = vmand %vm1223_vm5, %vm1227_vm6 }
  0x7c   : > { %v418_v29 = vsel %vm335_vm7, 1, %v1018_v17 }
  0x7d   : > { %v419_v32 = vadd.s32 %v418_v29, %v417_v27 }
  0x7e   : > { %v796_v33 = vpop.eup %795 }
  0x7f   : > { %420 = vst.msk [vmem:[#allocation3] sm:$0x3] %vm1235_vm8, %v419_v32  ;;  %v342_v34 = vadd.f32 1.0, %v796_v33  ;;  %v345_v38 = vmul.f32 -0.5, %v796_v33  ;;  %v348_v42 = vand.u32 2147483647, %v796_v33 }
  0x81   : > { %797 = vlog2.f32 %v342_v34  ;;  %v346_v41 = vadd.f32 1.0, %v345_v38  ;;  %vm349_vm11 = vcmp.lt.f32.partialorder %v348_v42, 0.0004427343 }
  0x83   : > { %v347_v45 = vmul.f32 %v796_v33, %v346_v41 }
  0x86   : > { %v450_v8 = vld [vmem:[#allocation3] sm:$0x3] (%p291_p3) }
  0x87   : > { %v454_v10 = vrot.slane (%p291_p3), %v450_v8, %v354_v30  ;;  %v458_v11 = vrot.slane (%p291_p3), %v450_v8, %v358_v31 }
  0x89   : > { %v459_v14 = vsel (%p291_p3), %vm435_vm13, %v454_v10, 0  ;;  %v460_v15 = vsel (%p291_p3), %vm435_vm13, %v458_v11, 0 }
  0x8a   : > { %v461_v18 = vadd.s32 (%p291_p3), %v460_v15, %v459_v14 }
  0x8c   : > { %v463_v20 = vshrl.u32 (%p291_p3), %v461_v18, 16  ;;  %v462_v21 = vand.u32 (%p291_p3), 65535, %v461_v18 }
  0x8e   : > { %v798_v46 = vpop.eup %797  ;;  %v465_v22 = vcvt.s32.f32 (%p291_p3), %v463_v20  ;;  %v464_v23 = vcvt.s32.f32 (%p291_p3), %v462_v21 }
  0x8f   : > { %v344_v48 = vmul.f32 0.6931472, %v798_v46 }
  0x90   : > { %468 = vadd.xlane.f32.xlu0 (%p291_p3), %v465_v22 }
  0x91   : > { %v350_v49 = vsel %vm349_vm11, %v347_v45, %v344_v48 }
  0x92   : > { %v372_v50 = vadd.f32 %v371_v47, %v350_v49 }
  0x94   : > { %v374_v51 = vcombine.high %v372_v50, %v372_v50  ;;  %v377_v52 = vsel %vm376_vm12, %v372_v50, 0.0  ;;  %466 = vadd.xlane.f32.xlu0 (%p291_p3), %v464_v23 }
  0x95   : > { %v378_v53 = vrot.slane %v377_v52, 4 }
  0x96   : > { %v384_v54 = vsel %vm376_vm12, %v374_v51, 0.0 }
  0x97   : > { %v379_v55 = vadd.f32 %v378_v53, %v377_v52  ;;  %v385_v56 = vrot.slane %v384_v54, 4 }
  0x99   : > { %v380_v57 = vrot.slane %v379_v55, 2  ;;  %v386_v58 = vadd.f32 %v385_v56, %v384_v54 }
  0x9b   : > { %v381_v59 = vadd.f32 %v380_v57, %v379_v55  ;;  %v387_v60 = vrot.slane %v386_v58, 2 }
  0x9d   : > { %v382_v61 = vrot.slane %v381_v59, 1  ;;  %v388_v62 = vadd.f32 %v387_v60, %v386_v58 }
  0x9f   : > { %v383_v63 = vadd.f32 %v382_v61, %v381_v59  ;;  %v389_v0 = vrot.slane %v388_v62, 1 }
  0xa1   : > { %v390_v1 = vadd.f32 %v389_v0, %v388_v62 }
  0xa3   : > { %v394_v2 = vcombine.low %v383_v63, %v390_v1 }
  0xa5   : > { %v401_v3 = vrot.slane %v394_v2, %v325_v19 }
  0xa7   : > { %v408_v5 = vrot.slane %v401_v3, %v325_v19 }
  0xa8   : > { %422 = sbr.rel (!%p291_p3) target bundleno = 388 (0x184), region = 44 }
  0xa9   : > { %v410_v6 = vsel %vm335_vm7, %v408_v5, 0.0 }
  0xaa   : > { %v411_v7 = vadd.f32 %v410_v6, %v391_v4 }
  0xac   : > { %416 = vst.msk [vmem:[#allocation2] sm:$0x3] %vm1235_vm8, %v411_v7 }
  0xb3   : > { %v423_v9 = vld [vmem:[#allocation2] sm:$0x3] }
  0xb4   : > { %v428_v12 = vrot.slane %v423_v9, %v354_v30  ;;  %v432_v13 = vrot.slane %v423_v9, %v358_v31 }
  0xb6   : > { %v436_v16 = vsel %vm435_vm13, %v428_v12, 0.0  ;;  %v437_v17 = vsel %vm435_vm13, %v432_v13, 0.0 }
  0xb7   : > { %v438_v19 = vadd.f32 %v437_v17, %v436_v16 }
  0xb9   : > { %439 = vadd.xlane.f32.xlu1 %v438_v19 }
 0x119   : > { %v469_v27 = vpop.xlane.xlu0 %468 }
 0x11a   : > { %v471_v28 = vcvt.f32.s32 %v469_v27 }
 0x11c   : > { %v472_v32 = vshll.u32 %v471_v28, 16 }
 0x11d   : > { %v467_v31 = vpop.xlane.xlu0 %466 }
 0x11e   : > { %v470_v33 = vcvt.f32.s32 %v467_v31 }
 0x120   : > { %v473_v35 = vadd.s32 %v472_v32, %v470_v33 }
 0x122   : > { %v474_v37 = vrot.slane %v473_v35, 4 }
 0x124   : > { %v475_v38 = vadd.s32 %v474_v37, %v473_v35 }
 0x126   : > { %v476_v39 = vrot.slane %v475_v38, 2 }
 0x128   : > { %v477_v40 = vadd.s32 %v476_v39, %v475_v38 }
 0x12a   : > { %v478_v41 = vrot.slane %v477_v40, 1 }
 0x12c   : > { %v479_v42 = vadd.s32 %v478_v41, %v477_v40 }
 0x142   : > { %v440_v24 = vpop.xlane.xlu1 %439 }
 0x143   : > { %v441_v25 = vrot.slane %v440_v24, 4 }
 0x145   : > { %v442_v26 = vadd.f32 %v441_v25, %v440_v24 }
 0x147   : > { %v443_v29 = vrot.slane %v442_v26, 2 }
 0x149   : > { %v444_v30 = vadd.f32 %v443_v29, %v442_v26 }
 0x14b   : > { %v445_v34 = vrot.slane %v444_v30, 1 }
 0x14d   : > { %v446_v36 = vadd.f32 %v445_v34, %v444_v30 }
 0x14f   : > { %674 = vpush %v446_v36 }
 0x150   : > { %676 = vpush %v479_v42 }
 0x180   : > { %s675_s18 = spop %674 }
 0x181   : > { %v448_v43 = vstv %s675_s18  ;;  %s677_s28 = spop %676 }
 0x182   : > { %449 = vst [vmem:[%s272_s24] sm:$0x1] %v448_v43  ;;  %v481_v44 = vstv %s677_s28 }
 0x183   : > { %482 = vst [vmem:[%s278_s25] sm:$0x1] %v481_v44 }
 0x184 PF: > { %s668_s5 = sshll.u32 %s999_s19, 4  ;;  %s500_s11 = sshll.u32 %s272_s24, 4  ;;  %s501_s11 = int_to_ptr.vmem [resolvable:$true] %s500_s11 }
 0x185   : > { %s498_s21 = scalar_lea.hbm %s1339_s2, %s668_s5  ;;  %s484_s8 = scalar_lea.sflag [#allocation6], %s1215_s0 }
 0x186   : > { %s855_s15 = scalar_lea.vmem %s501_s11, 16  ;;  %p1367_p9 = scmp.ne.s32.totalorder %s1353_s6, 0 }
 0x187   : > { %p856_p7 = scmp.ne.s32.totalorder %s501_s11, %s855_s15  ;;  %s1019_s29 = smov [#allocation9]  }
 0x188   : > { %s859_s30 = sshll.u32 %s1019_s29, 4  ;;  %s860_s30 = int_to_ptr.vmem [resolvable:$false] %s859_s30 }
 0x189   : > { %p857_p12 = pnand %p856_p7, %p1367_p9  ;;  %s861_s20 = scalar_lea.vmem %s860_s30, 32 }
 0x18a   : > { %p862_p0 = scmp.lt.s32.totalorder %s501_s11, %s860_s30  ;;  %p863_p1 = scmp.lt.s32.totalorder %s861_s20, %s855_s15 }
 0x18b   : > { %p858_p6 = pneg %p857_p12 }
 0x18c   : > { %p864_p8 = por %p863_p1, %p862_p0 }
 0x18e   : > { %p865_p10 = pnand %p864_p8, %p858_p6 }
 0x190   : > { %868 = shalt.err (!%p865_p10)
}
 0x191   : > { %s869_s26 = scalar_lea.hbm %s498_s21, 16  ;;  %s873_s4 = scalar_lea.hbm %s1339_s2, 32 }
 0x192   : > { %p870_p11 = scmp.ne.s32.totalorder %s498_s21, %s869_s26  ;;  %p874_p4 = scmp.lt.s32.totalorder %s498_s21, %s1339_s2 }
 0x193   : > { %p875_p13 = scmp.lt.s32.totalorder %s873_s4, %s869_s26 }
 0x194   : > { %p871_p5 = pnand %p870_p11, %p1367_p9 }
 0x195   : > { %p876_p3 = por %p875_p13, %p874_p4 }
 0x196   : > { %p872_p2 = pneg %p871_p5 }
 0x198   : > { %p877_p7 = pnand %p876_p3, %p872_p2 }
 0x19a   : > { %880 = shalt.err (!%p877_p7)
}
 0x19b   : > { %682 = dma.vmem_to_hbm [thread:$0]  (%p1367_p9), %s501_s11, 16, %s498_s21, %s484_s8  }
 0x19c   : > { %s511_s15 = scalar_lea.hbm %s1340_s3, %s668_s5  ;;  %s513_s29 = sshll.u32 %s278_s25, 4  ;;  %s514_s29 = int_to_ptr.vmem [resolvable:$true] %s513_s29 }
 0x19d   : > { %s488_s30 = scalar_lea.sflag [#allocation11], %s1215_s0  ;;  %s881_s20 = scalar_lea.vmem %s514_s29, 16 }
 0x19e   : > { %p882_p12 = scmp.ne.s32.totalorder %s514_s29, %s881_s20  ;;  %s1020_s26 = smov [#allocation10]  }
 0x19f   : > { %s885_s23 = sshll.u32 %s1020_s26, 4  ;;  %s886_s23 = int_to_ptr.vmem [resolvable:$false] %s885_s23 }
 0x1a0   : > { %p883_p6 = pnand %p882_p12, %p1367_p9  ;;  %s887_s24 = scalar_lea.vmem %s886_s23, 32 }
 0x1a1   : > { %p888_p1 = scmp.lt.s32.totalorder %s514_s29, %s886_s23  ;;  %p889_p8 = scmp.lt.s32.totalorder %s887_s24, %s881_s20 }
 0x1a2   : > { %p884_p0 = pneg %p883_p6 }
 0x1a3   : > { %p890_p10 = por %p889_p8, %p888_p1 }
 0x1a5   : > { %p891_p11 = pnand %p890_p10, %p884_p0 }
 0x1a7   : > { %894 = shalt.err (!%p891_p11)
}
 0x1a8   : > { %s895_s19 = scalar_lea.hbm %s511_s15, 16  ;;  %s899_s5 = scalar_lea.hbm %s1340_s3, 32 }
 0x1a9   : > { %p896_p5 = scmp.ne.s32.totalorder %s511_s15, %s895_s19  ;;  %p900_p13 = scmp.lt.s32.totalorder %s511_s15, %s1340_s3 }
 0x1aa   : > { %p901_p3 = scmp.lt.s32.totalorder %s899_s5, %s895_s19 }
 0x1ab   : > { %p897_p2 = pnand %p896_p5, %p1367_p9 }
 0x1ac   : > { %p902_p7 = por %p901_p3, %p900_p13 }
 0x1ad   : > { %p898_p4 = pneg %p897_p2 }
 0x1af   : > { %p903_p12 = pnand %p902_p7, %p898_p4 }
 0x1b1   : > { %906 = shalt.err (!%p903_p12)
}
 0x1b2   : > { %683 = dma.vmem_to_hbm [thread:$0]  (%p1367_p9), %s514_s29, 16, %s511_s15, %s488_s30  }
 0x1b3 PF: > { %p701_p6 = scmp.ge.s32.totalorder %s1011_s22, 2  ;;  %s525_s8 = sand.u32 1, %s971_s12  }
 0x1b4   : > { %p1368_p0 = scmp.ne.s32.totalorder %s1355_s10, 0  ;;  %s526_s4 = scalar_lea.sflag [#allocation6], %s525_s8 }
 0x1b6   : > { %p694_p1 = pnand %p701_p6, %p1368_p0 }
 0x1b8   : > { %p695_p8 = pneg %p694_p1 }
 0x1ba   : > { %960 = dma.done.wait (%p695_p8), %s526_s4, 16  }
 0x1bb   : > { %962 = vsyncadd (%p695_p8), %s526_s4, 4294967280  ;;  %s534_s18 = scalar_lea.sflag [#allocation11], %s525_s8 }
 0x1bc   : > { %964 = dma.done.wait (%p695_p8), %s534_s18, 16  }
 0x1bd   : > { %966 = vsyncadd (%p695_p8), %s534_s18, 4294967280  ;;  %s26_s22 = sadd.s32 1, %s1011_s22   ;;  %s1369_s6 = sld [smem:[#allocation20_spill]] }
 0x1be   : > { %p23_p10 = scmp.ge.s32.totalorder %s26_s22, 6   ;;  %s1370_s18 = sld [smem:[#allocation16_spill]] }
 0x1bf   : > { %s1371_s19 = sld [smem:[#allocation17_spill]]  ;;  %s1374_s12 = smov %s975_s13 }
 0x1c0   : > { %s1372_s20 = sld [smem:[#allocation18_spill]]  ;;  %s1375_s13 = smov %s979_s14 }
 0x1c1   : > { %s1373_s21 = sld [smem:[#allocation19_spill]]  ;;  %s1376_s14 = smov %s1130_s7 }
 0x1c2   : > { %s1377_s15 = smov %s987_s16  ;;  %s1378_s16 = smov %s991_s17 }
 0x1c3   : > { %s1379_s17 = smov %s1369_s6  ;;  %25 = sbr.rel (!%p23_p10) target bundleno = 15 (0xf), region = 111 }
 0x1c8   :  { %538 = vsyncpa [#allocation5], 1 }
 0x1c9   :  { %540 = vsyncpa [#allocation5 + $0x1], 1 }
 0x1ca   :  { %541 = vsyncpa [#allocation8], 1 }
 0x1cb   :  { %543 = vsyncpa [#allocation8 + $0x1], 1 }
 0x1cc   :  { %544 = vsyncpa [#allocation6], 1 }
 0x1cd   :  { %546 = vsyncpa [#allocation6 + $0x1], 1 }
 0x1ce   :  { %547 = vsyncpa [#allocation11], 1 }
 0x1cf   :  { %549 = vsyncpa [#allocation11 + $0x1], 1 }

</bundles_post_ra>
